<compile_context>
chip_gen: v6e
topology: v6e:2x2x1
jax: 0.10.0
libtpu: 0.0.40
codegen_flags: <defaults>
</compile_context>

<pallas_src>
import jax
import jax.numpy as jnp
from jax.experimental import pallas as pl
from jax.experimental.pallas import tpu as pltpu


# ----------------------------------------------------------------------------
# Kernel
# ----------------------------------------------------------------------------
def self_attention_kernel(x_ref, w1_ref, b1_ref, w2_ref, b2_ref,
                          out_ref, weights_ref):
    # x_ref:       (TB, S, H)  native dtype
    # w1_ref:      (H, 64)     pre-cast to x dtype (MXU operand)
    # b1_ref:      (1, 64) f32   w2_ref: (1, 64) f32   b2_ref: (1, 1) f32
    # out_ref:     (TB, H)     weights_ref: (TB, S)
    TB, S, H = x_ref.shape
    x = x_ref[...]                                   # single read, native dtype

    # ---- Linear(H -> 64) + ReLU on the MXU, f32 accumulation ---------------
    # Merge leading dims so the MXU sees M = TB*S rows.  Layout view when
    # S % sublane_pack == 0.
    x2d = x.reshape(TB * S, H)
    h = jnp.dot(x2d, w1_ref[...], preferred_element_type=jnp.float32)  # (TB*S, 64)
    h = jnp.maximum(h + b1_ref[...], 0.0)                              # f32 VPU

    # ---- Linear(64 -> 1): lane-axis reduce (XLU) instead of an N=1 matmul --
    h3 = h.reshape(TB, S, 64)                         # view when S % 8 == 0 (h is f32)
    energy = jnp.sum(h3 * w2_ref[...], axis=-1) + b2_ref[...]          # (TB, S) f32

    # ---- softmax over the sequence, 2D / lane-major -------------------------
    e_max = jnp.max(energy, axis=-1, keepdims=True)                    # (TB, 1)
    p = jnp.exp(energy - e_max)                                        # EUP
    denom = jnp.sum(p, axis=-1, keepdims=True)                         # (TB, 1)
    inv = pl.reciprocal(denom, approx=True)                            # EUP vrcp
    inv = inv * (2.0 - denom * inv)                                    # Newton -> f32 exact
    weights = p * inv                                                  # (TB, S) f32

    # ---- weighted sum over S: VPU multiply + sublane/XLU reduce -------------
    # (avoids TB degenerate M=1 MXU pushes; keeps VPU math in f32 for v5e)
    xf = x.astype(jnp.float32)
    ctx = jnp.sum(xf * weights[:, :, None], axis=1)                    # (TB, H) f32

    out_ref[...] = ctx.astype(out_ref.dtype)
    weights_ref[...] = weights.astype(weights_ref.dtype)


# ----------------------------------------------------------------------------
# Hardware queries (best-effort, with conservative fallbacks)
# ----------------------------------------------------------------------------
def _vmem_capacity_bytes():
    try:
        info = pltpu.get_tpu_info()
        cap = getattr(info, "vmem_capacity_bytes", None)
        if cap:
            return int(cap)
    except Exception:
        pass
    return 64 * 1024 * 1024          # conservative (v7x physical); safe everywhere


def _is_multi_tc():
    # v7x has 2 TensorCores per chip; v5e/v6e have 1.
    try:
        kind = jax.devices()[0].device_kind.lower()
        return "v7" in kind
    except Exception:
        return False


# ----------------------------------------------------------------------------
# Block-size selection & wrapper
# ----------------------------------------------------------------------------
def _block_vmem_bytes(tb, seq, hidden, x_itemsize):
    """Approximate VMEM footprint of one grid program for block_b = tb."""
    rows = tb * seq
    x_blk = rows * hidden * x_itemsize         # one x buffer
    h_f32 = rows * 64 * 4                      # f32 hidden activations
    x_f32 = rows * hidden * 4                  # f32 copy for the weighted sum
    outs = tb * (hidden + seq) * max(x_itemsize, 4)
    # double-buffered x + outputs; single copy of the f32 intermediates
    return 2 * x_blk + 2 * outs + h_f32 + x_f32


def _choose_block_b(batch, seq, hidden, x_itemsize, vmem_cap, multi_tc,
                    target_rows=2048):
    """Largest divisor of `batch` whose block fits the VMEM budget and whose
    row count (block_b*S) is <= target_rows.  On v7x (2 TCs) the grid is only
    split into >=2 programs if each program still gets >= 512 rows."""
    budget = int(0.45 * vmem_cap)
    best = 1
    for tb in range(1, batch + 1):
        if batch % tb:
            continue
        if tb * seq <= target_rows and _block_vmem_bytes(tb, seq, hidden,
                                                         x_itemsize) <= budget:
            best = tb
    if multi_tc and batch // best < 2:
        for tb in range(best - 1, 0, -1):
            if batch % tb == 0 and batch // tb >= 2 and tb * seq >= 512:
                best = tb
                break
    return best


def self_attention(encoder_outputs, w1, b1, w2, b2, *, block_b=None):
    B, S, H = encoder_outputs.shape
    assert w1.shape == (H, 64) and w2.shape == (64, 1)
    x_dtype = encoder_outputs.dtype
    itemsize = jnp.dtype(x_dtype).itemsize

    # Pre-cast params once in the wrapper (XLA does this outside the kernel):
    #   - w1 in the x dtype for the MXU operand,
    #   - b1/w2/b2 in f32 for the VPU math.
    w1_c = w1.astype(x_dtype)
    b1_2d = b1.reshape(1, 64).astype(jnp.float32)
    w2_row = w2.reshape(1, 64).astype(jnp.float32)   # (64,1) -> (1,64) lane-major
    b2_2d = b2.reshape(1, 1).astype(jnp.float32)

    vmem_cap = _vmem_capacity_bytes()
    multi_tc = _is_multi_tc()

    if block_b is None:
        block_b = _choose_block_b(B, S, H, itemsize, vmem_cap, multi_tc)
    if B % block_b != 0:
        block_b = 1
    grid = (B // block_b,)

    # VMEM limit derived from the actual block sizes, capped below the queried
    # physical VMEM (~48 MiB on v7x's 64 MiB, up to ~96 MiB on v5e/v6e's 128 MiB).
    params_bytes = (H * 64) * jnp.dtype(w1_c.dtype).itemsize + (64 + 64 + 1) * 4
    need = _block_vmem_bytes(block_b, S, H, itemsize) + 2 * params_bytes
    cap = min(int(0.75 * vmem_cap), 100 * 1024 * 1024)
    vmem_limit = int(min(max(int(1.5 * need), 32 * 1024 * 1024), cap))

    out_shapes = (
        jax.ShapeDtypeStruct((B, H), x_dtype),
        jax.ShapeDtypeStruct((B, S), x_dtype),
    )

    grid_spec = pltpu.PrefetchScalarGridSpec(
        num_scalar_prefetch=0,
        grid=grid,
        in_specs=[
            pl.BlockSpec((block_b, S, H), lambda b: (b, 0, 0)),   # x block
            # Constant index maps: Pallas only re-fetches these when the block
            # index changes (i.e. never after the first grid step).
            pl.BlockSpec((H, 64), lambda b: (0, 0)),              # w1 (x dtype)
            pl.BlockSpec((1, 64), lambda b: (0, 0)),              # b1 (f32)
            pl.BlockSpec((1, 64), lambda b: (0, 0)),              # w2 row (f32)
            pl.BlockSpec((1, 1),  lambda b: (0, 0)),              # b2 (f32)
        ],
        out_specs=[
            pl.BlockSpec((block_b, H), lambda b: (b, 0)),         # outputs
            pl.BlockSpec((block_b, S), lambda b: (b, 0)),         # weights
        ],
    )

    return pl.pallas_call(
        self_attention_kernel,
        out_shape=out_shapes,
        grid_spec=grid_spec,
        compiler_params=pltpu.CompilerParams(
            dimension_semantics=("parallel",),
            vmem_limit_bytes=vmem_limit),
    )(encoder_outputs, w1_c, b1_2d, w2_row, b2_2d)


# ----------------------------------------------------------------------------
# Pure-JAX reference (mirrors the PyTorch module)
# ----------------------------------------------------------------------------
def self_attention_ref(encoder_outputs, w1, b1, w2, b2):
    h = jnp.maximum(jnp.einsum("bsh,hk->bsk", encoder_outputs, w1) + b1, 0.0)
    energy = jnp.einsum("bsk,ko->bso", h, w2) + b2            # (B, S, 1)
    weights = jax.nn.softmax(energy[..., 0], axis=1)          # (B, S)
    outputs = jnp.sum(encoder_outputs * weights[..., None], axis=1)
    return outputs, weights


if __name__ == "__main__":
    B, S, H = 2, 8, 32
    key = jax.random.PRNGKey(0)
    kx, k1, k2, k3, k4 = jax.random.split(key, 5)

    x = jax.random.normal(kx, (B, S, H), dtype=jnp.float32)

    # deterministic parameter init (PyTorch Linear-like uniform bounds)
    bound1 = 1.0 / (H ** 0.5)
    w1 = jax.random.uniform(k1, (H, 64), jnp.float32, -bound1, bound1)
    b1 = jax.random.uniform(k2, (64,), jnp.float32, -bound1, bound1)
    bound2 = 1.0 / (64 ** 0.5)
    w2 = jax.random.uniform(k3, (64, 1), jnp.float32, -bound2, bound2)
    b2 = jax.random.uniform(k4, (1,), jnp.float32, -bound2, bound2)

    out, weights = self_attention(x, w1, b1, w2, b2)
    jax.block_until_ready((out, weights))

    out_ref, weights_ref = self_attention_ref(x, w1, b1, w2, b2)
    assert jnp.allclose(out, out_ref, atol=1e-5, rtol=1e-5)
    assert jnp.allclose(weights, weights_ref, atol=1e-5, rtol=1e-5)

    print("KERNEL_OK")
</pallas_src>

<mosaic_0001>
module attributes {stable_mosaic.version = 11 : i64} {
  func.func @self_attention_kernel(%arg0: i32, %arg1: memref<2x8x32xf32, #tpu.memory_space<vmem>>, %arg2: memref<32x64xf32, #tpu.memory_space<vmem>>, %arg3: memref<1x64xf32, #tpu.memory_space<vmem>>, %arg4: memref<1x64xf32, #tpu.memory_space<vmem>>, %arg5: memref<1x1xf32, #tpu.memory_space<vmem>>, %arg6: memref<2x32xf32, #tpu.memory_space<vmem>>, %arg7: memref<2x8xf32, #tpu.memory_space<vmem>>) attributes {dimension_semantics = [#tpu.dimension_semantics<parallel>], iteration_bounds = array<i64: 1>, scalar_prefetch = 0 : i64, scratch_operands = 0 : i64, tpu.core_type = #tpu.core_type<tc>, window_params = [{transform_indices = @transform_0, window_bounds = array<i64: 2, 8, 32>}, {pipeline_mode = #tpu.pipeline_mode<synchronous>, transform_indices = @transform_1, window_bounds = array<i64: 32, 64>}, {pipeline_mode = #tpu.pipeline_mode<synchronous>, transform_indices = @transform_2, window_bounds = array<i64: 1, 64>}, {pipeline_mode = #tpu.pipeline_mode<synchronous>, transform_indices = @transform_3, window_bounds = array<i64: 1, 64>}, {pipeline_mode = #tpu.pipeline_mode<synchronous>, transform_indices = @transform_4, window_bounds = array<i64: 1, 1>}, {transform_indices = @transform_5, window_bounds = array<i64: 2, 32>}, {transform_indices = @transform_6, window_bounds = array<i64: 2, 8>}]} {
    %c0 = arith.constant 0 : index
    %c0_0 = arith.constant 0 : index
    %c0_1 = arith.constant 0 : index
    %0 = vector.load %arg1[%c0, %c0_0, %c0_1] : memref<2x8x32xf32, #tpu.memory_space<vmem>>, vector<2x8x32xf32>
    %1 = vector.shape_cast %0 : vector<2x8x32xf32> to vector<16x32xf32>
    %c0_2 = arith.constant 0 : index
    %c0_3 = arith.constant 0 : index
    %2 = vector.load %arg2[%c0_2, %c0_3] : memref<32x64xf32, #tpu.memory_space<vmem>>, vector<32x64xf32>
    %cst = arith.constant dense<0.000000e+00> : vector<16x64xf32>
    %3 = tpu.matmul %1, %2, %cst {dimension_numbers = #tpu.dot_dimension_numbers<[1], [0], [0], [1], [0, 0, 1, 1], [], []>} : vector<16x32xf32>, vector<32x64xf32>, vector<16x64xf32> -> vector<16x64xf32>
    %c0_4 = arith.constant 0 : index
    %c0_5 = arith.constant 0 : index
    %4 = vector.load %arg3[%c0_4, %c0_5] : memref<1x64xf32, #tpu.memory_space<vmem>>, vector<1x64xf32>
    %5 = vector.broadcast %4 : vector<1x64xf32> to vector<16x64xf32>
    %6 = arith.addf %3, %5 : vector<16x64xf32>
    %cst_6 = arith.constant 0.000000e+00 : f32
    %7 = vector.broadcast %cst_6 : f32 to vector<16x64xf32>
    %8 = arith.maximumf %6, %7 : vector<16x64xf32>
    %9 = vector.shape_cast %8 : vector<16x64xf32> to vector<2x8x64xf32>
    %c0_7 = arith.constant 0 : index
    %c0_8 = arith.constant 0 : index
    %10 = vector.load %arg4[%c0_7, %c0_8] : memref<1x64xf32, #tpu.memory_space<vmem>>, vector<1x64xf32>
    %11 = vector.shape_cast %10 : vector<1x64xf32> to vector<1x1x64xf32>
    %12 = vector.broadcast %11 : vector<1x1x64xf32> to vector<2x8x64xf32>
    %13 = arith.mulf %9, %12 : vector<2x8x64xf32>
    %cst_9 = arith.constant dense<0.000000e+00> : vector<2x8xf32>
    %14 = vector.multi_reduction <add>, %13, %cst_9 [2] : vector<2x8x64xf32> to vector<2x8xf32>
    %c0_10 = arith.constant 0 : index
    %c0_11 = arith.constant 0 : index
    %15 = vector.load %arg5[%c0_10, %c0_11] : memref<1x1xf32, #tpu.memory_space<vmem>>, vector<1x1xf32>
    %16 = vector.broadcast %15 : vector<1x1xf32> to vector<2x8xf32>
    %17 = arith.addf %14, %16 : vector<2x8xf32>
    %cst_12 = arith.constant dense<0xFF800000> : vector<2xf32>
    %18 = vector.multi_reduction <maximumf>, %17, %cst_12 [1] : vector<2x8xf32> to vector<2xf32>
    %19 = vector.shape_cast %18 : vector<2xf32> to vector<2x1xf32>
    %20 = vector.broadcast %19 : vector<2x1xf32> to vector<2x8xf32>
    %21 = arith.subf %17, %20 : vector<2x8xf32>
    %22 = math.exp %21 : vector<2x8xf32>
    %cst_13 = arith.constant dense<0.000000e+00> : vector<2xf32>
    %23 = vector.multi_reduction <add>, %22, %cst_13 [1] : vector<2x8xf32> to vector<2xf32>
    %24 = vector.shape_cast %23 : vector<2xf32> to vector<2x1xf32>
    %25 = tpu.reciprocal %24 {approx = true} : vector<2x1xf32> -> vector<2x1xf32>
    %26 = arith.mulf %24, %25 : vector<2x1xf32>
    %cst_14 = arith.constant 2.000000e+00 : f32
    %27 = vector.broadcast %cst_14 : f32 to vector<2x1xf32>
    %28 = arith.subf %27, %26 : vector<2x1xf32>
    %29 = arith.mulf %25, %28 : vector<2x1xf32>
    %30 = vector.broadcast %29 : vector<2x1xf32> to vector<2x8xf32>
    %31 = arith.mulf %22, %30 : vector<2x8xf32>
    %32 = vector.shape_cast %31 : vector<2x8xf32> to vector<2x8x1xf32>
    %33 = vector.broadcast %32 : vector<2x8x1xf32> to vector<2x8x32xf32>
    %34 = arith.mulf %0, %33 : vector<2x8x32xf32>
    %cst_15 = arith.constant dense<0.000000e+00> : vector<2x32xf32>
    %35 = vector.multi_reduction <add>, %34, %cst_15 [1] : vector<2x8x32xf32> to vector<2x32xf32>
    %c0_16 = arith.constant 0 : index
    %c0_17 = arith.constant 0 : index
    %36 = vector.load %arg6[%c0_16, %c0_17] : memref<2x32xf32, #tpu.memory_space<vmem>>, vector<2x32xf32>
    tpu.vector_store %arg6[%c0_16, %c0_17], %35 {strides = array<i32>} : memref<2x32xf32, #tpu.memory_space<vmem>>, vector<2x32xf32>,
    %c0_18 = arith.constant 0 : index
    %c0_19 = arith.constant 0 : index
    %37 = vector.load %arg7[%c0_18, %c0_19] : memref<2x8xf32, #tpu.memory_space<vmem>>, vector<2x8xf32>
    tpu.vector_store %arg7[%c0_18, %c0_19], %31 {strides = array<i32>} : memref<2x8xf32, #tpu.memory_space<vmem>>, vector<2x8xf32>,
    return
  }
  func.func @transform_0(%arg0: i32) -> (i32, i32, i32) {
    %c0_i32 = arith.constant 0 : i32
    %c0_i32_0 = arith.constant 0 : i32
    %c0_i32_1 = arith.constant 0 : i32
    return %arg0, %c0_i32, %c0_i32_0 : i32, i32, i32
  }
  func.func @transform_1(%arg0: i32) -> (i32, i32) {
    %c0_i32 = arith.constant 0 : i32
    %c0_i32_0 = arith.constant 0 : i32
    %c0_i32_1 = arith.constant 0 : i32
    return %c0_i32, %c0_i32_0 : i32, i32
  }
  func.func @transform_2(%arg0: i32) -> (i32, i32) {
    %c0_i32 = arith.constant 0 : i32
    %c0_i32_0 = arith.constant 0 : i32
    %c0_i32_1 = arith.constant 0 : i32
    return %c0_i32, %c0_i32_0 : i32, i32
  }
  func.func @transform_3(%arg0: i32) -> (i32, i32) {
    %c0_i32 = arith.constant 0 : i32
    %c0_i32_0 = arith.constant 0 : i32
    %c0_i32_1 = arith.constant 0 : i32
    return %c0_i32, %c0_i32_0 : i32, i32
  }
  func.func @transform_4(%arg0: i32) -> (i32, i32) {
    %c0_i32 = arith.constant 0 : i32
    %c0_i32_0 = arith.constant 0 : i32
    %c0_i32_1 = arith.constant 0 : i32
    return %c0_i32, %c0_i32_0 : i32, i32
  }
  func.func @transform_5(%arg0: i32) -> (i32, i32) {
    %c0_i32 = arith.constant 0 : i32
    %c0_i32_0 = arith.constant 0 : i32
    return %arg0, %c0_i32 : i32, i32
  }
  func.func @transform_6(%arg0: i32) -> (i32, i32) {
    %c0_i32 = arith.constant 0 : i32
    %c0_i32_0 = arith.constant 0 : i32
    return %arg0, %c0_i32 : i32, i32
  }
}

</mosaic_0001>

<bundles_post_ra>
// kernel: tpu_custom_call.1
= control target key start
LH: loop header
LB: loop body
LE: loop exit
PB: predicated region body
PF: predicated region fallthrough
CT: control target
= control target key end

     0   :  { %s533_s0 = inlined_call_operand.hbm [shape: f32[2,8,32], index: 0, kind: input, shape index: {}]   ;;  %s534_s1 = inlined_call_operand.hbm [shape: f32[32,64], index: 1, kind: input, shape index: {}]   ;;  %s535_s2 = inlined_call_operand.vmem [shape: f32[1,64], index: 2, kind: input, shape index: {}]   ;;  %s536_s3 = inlined_call_operand.vmem [shape: f32[1,64], index: 3, kind: input, shape index: {}]   ;;  %s537_s4 = inlined_call_operand.<no memory space> [shape: f32[1,1], index: 4, kind: input, shape index: {}]   ;;  %s538_s5 = inlined_call_operand.hbm [shape: f32[2,32], index: 5, kind: output, shape index: {0}]   ;;  %s539_s6 = inlined_call_operand.hbm [shape: f32[2,8], index: 6, kind: output, shape index: {1}]  }
   0x1   :  { %v12_v0 = vstv %s537_s4 }
   0x2   :  { %13 = vst [vmem:[#allocation2] sm:$0x1] %v12_v0 }
   0x3   :  { %14 = vsyncpa [#allocation4], 0 }
   0x4   :  { %15 = vsyncpa [#allocation7], 0 }
   0x5   :  { %16 = vsyncpa [#allocation5], 0 }
   0x6   :  { %17 = vsyncpa [#allocation10], 0  ;;  %s451_s23 = smov [#allocation3]  }
   0x7   :  { %s23_s24 = sshll.u32 %s451_s23, 4  ;;  %s24_s24 = int_to_ptr.vmem [resolvable:$true] %s23_s24 }
   0x8   :  { %s371_s25 = scalar_lea.vmem %s24_s24, 256  ;;  %p376_p1 = scmp.lt.s32.totalorder %s24_s24, %s24_s24 }
   0x9   :  { %p372_p0 = scmp.ne.s32.totalorder %s24_s24, %s371_s25  ;;  %p377_p2 = scmp.lt.s32.totalorder %s371_s25, %s371_s25 }
   0xb   :  { %p378_p3 = por %p377_p2, %p376_p1 }
   0xd   :  { %p379_p4 = pnand %p378_p3, %p372_p0 }
   0xf   :  { %382 = shalt.err (!%p379_p4)
}
  0x10   :  { %s452_s26 = smov 128   ;;  %s453_s27 = smov 8  }
  0x11   :  { %29 = dma.hbm_to_vmem [thread:$0]  %s533_s0, 256, %s24_s24, [#allocation4], %s452_s26, %s452_s26, %s453_s27  }
  0x12   :  { %s454_s4 = smov [#allocation6]  }
  0x13   :  { %s35_s30 = sshll.u32 %s454_s4, 4  ;;  %s36_s30 = int_to_ptr.vmem [resolvable:$true] %s35_s30 }
  0x14   :  { %s391_s7 = scalar_lea.vmem %s36_s30, 512  ;;  %p396_p6 = scmp.lt.s32.totalorder %s36_s30, %s36_s30 }
  0x15   :  { %p392_p5 = scmp.ne.s32.totalorder %s36_s30, %s391_s7  ;;  %p397_p7 = scmp.lt.s32.totalorder %s391_s7, %s391_s7 }
  0x17   :  { %p398_p8 = por %p397_p7, %p396_p6 }
  0x19   :  { %p399_p9 = pnand %p398_p8, %p392_p5 }
  0x1b   :  { %402 = shalt.err (!%p399_p9)
}
  0x1c   :  { %41 = dma.hbm_to_vmem [thread:$0]  %s534_s1, 512, %s36_s30, [#allocation7], %s452_s26, %s452_s26, %s453_s27  }
  0x1d   :  { %443 = dma.done.wait [#allocation4], 256  }
  0x1e   :  { %444 = vsyncadd [#allocation4], 4294967040 }
  0x1f   :  { %445 = dma.done.wait [#allocation7], 512  }
  0x20   :  { %446 = vsyncadd [#allocation7], 4294966784  ;;  %vm67_vm0 = vcmask 261120   ;;  %v59_v1 = vld [vmem:[#allocation6 + $0x18] sm:$0xff]  ;;  %v58_v2 = vld [vmem:[#allocation6 + $0x10] sm:$0xff]  ;;  %v455_v8 = vmov 0   ;;  %v181_v21 = vlaneseq }
  0x21   :  { %337 = vmatprep.subr.mxu0 %v59_v1  ;;  %v502_v3 = vld [vmem:[#allocation3] sm:$0xff]  ;;  %v57_v4 = vld [vmem:[#allocation6 + $0x8] sm:$0xff]  ;;  %v56_v5 = vld [vmem:[#allocation6] sm:$0xff]  ;;  %355 = vset.pattern.permute.xlu1 %v455_v8  ;;  %vm160_vm1 = vcmask 523264   ;;  %vm191_vm2 = vcmask 1041409   ;;  %vm194_vm3 = vcmask 58368  }
  0x22   :  { %338 = vmatpush3.msra.mxu0 %v59_v1  ;;  %345 = vmatprep.mubr.msk.f32.mxu0 %vm67_vm0, %v502_v3  ;;  %v506_v6 = vld [vmem:[#allocation3 + $0x8] sm:$0xff]  ;;  %v330_v7 = vld [vmem:[#allocation2] ss:$0 sm:$0xff]  ;;  %v182_v22 = vand.u32 127, %v181_v21  ;;  %v184_v23 = vshrl.u32 %v181_v21, 7 }
  0x23   :  { %339 = vmatprep.subr.mxu0 %v58_v2  ;;  %356 = vset.pattern.permute.xlu0 %v455_v8  ;;  %v326_v9 = vld [vmem:[%s535_s2] ss:$0 sm:$0xff]  ;;  %s456_s2 = smov [#allocation9]  }
  0x24   :  { %340 = vmatpush3.msra.mxu0 %v58_v2  ;;  %174 = vperm.xlu1 %355, %v330_v7   ;;  %v329_v16 = vld [vmem:[%s536_s3] ss:$0 sm:$0xff]  ;;  %v185_v26 = vsub.s32 %v182_v22, %v184_v23  ;;  %v201_v34 = vsub.s32 0, %v184_v23  ;;  %v205_v35 = vsub.s32 1, %v184_v23  ;;  %s312_s3 = sshll.u32 %s456_s2, 4  ;;  %s313_s3 = int_to_ptr.vmem [resolvable:$true] %s312_s3 }
  0x25   :  { %341 = vmatprep.subr.mxu0 %v57_v4  ;;  %s403_s12 = scalar_lea.vmem %s313_s3, 32  ;;  %p408_p11 = scmp.lt.s32.totalorder %s313_s3, %s313_s3 }
  0x26   :  { %342 = vmatpush3.msra.mxu0 %v57_v4  ;;  %p404_p10 = scmp.ne.s32.totalorder %s313_s3, %s403_s12  ;;  %p409_p12 = scmp.lt.s32.totalorder %s403_s12, %s403_s12 }
  0x27   :  { %343 = vmatprep.subr.mxu0 %v56_v5 }
  0x28   :  { %344 = vmatpush3.msra.mxu0 %v56_v5  ;;  %p410_p13 = por %p409_p12, %p408_p11 }
  0x29   :  { %346 = vmatmul.mubr.msk.f32.vlgmr.msra.gmra.mxu0 %vm67_vm0, %v506_v6 }
  0x2a   :  { %p411_p0 = pnand %p410_p13, %p404_p10 }
  0x9f   :  { %v175_v24 = vpop.permute.xlu1 %174 }
  0xe9   :  { %v347_v10 = vpop.f32.mrf.mxu0 }
  0xea   :  { %v146_v11 = vadd.f32 %v347_v10, %v326_v9 }
  0xeb   :  { %v140_v12 = vpop.f32.mrf.mxu0 }
  0xec   :  { %v141_v13 = vadd.f32 %v326_v9, %v140_v12  ;;  %v150_v14 = vmax.f32 %v146_v11, 0.0 }
  0xee   :  { %v149_v15 = vmax.f32 %v141_v13, 0.0  ;;  %v159_v19 = vmul.f32 %v329_v16, %v150_v14 }
  0xf0   :  { %v158_v17 = vmul.f32 %v329_v16, %v149_v15  ;;  %v164_v20 = vsel %vm160_vm1, %v159_v19, 0.0 }
  0xf2   :  { %v161_v18 = vsel %vm160_vm1, %v158_v17, 0.0 }
  0xf3   :  { %162 = vadd.xlane.f32.xlu0 %v161_v18 }
  0xf7   :  { %165 = vadd.xlane.f32.xlu0 %v164_v20 }
 0x17c   :  { %v163_v25 = vpop.xlane.xlu0 %162 }
 0x17d   :  { %v177_v27 = vadd.f32 %v175_v24, %v163_v25 }
 0x17f   :  { %v186_v30 = vrot.slane %v177_v27, %v185_v26 }
 0x180   :  { %v166_v28 = vpop.xlane.xlu0 %165 }
 0x181   :  { %v178_v29 = vadd.f32 %v175_v24, %v166_v28 }
 0x183   :  { %v190_v31 = vrot.slane %v178_v29, %v185_v26 }
 0x185   :  { %v192_v32 = vsel %vm191_vm2, %v190_v31, %v186_v30 }
 0x186   :  { %v195_v33 = vsel %vm194_vm3, %v192_v32, -inf }
 0x187   :  { %196 = vmax.xlane.f32.xlu1 %v195_v33 }
 0x210   :  { %v197_v36 = vpop.xlane.xlu1 %196 }
 0x211   :  { %v202_v37 = vrot.slane %v197_v36, %v201_v34  ;;  %v206_v38 = vrot.slane %v197_v36, %v205_v35 }
 0x213   :  { %v209_v39 = vsub.f32 %v177_v27, %v202_v37  ;;  %v210_v40 = vsub.f32 %v178_v29, %v206_v38 }
 0x215   :  { %v211_v41 = vmul.f32 1.442695, %v209_v39  ;;  %v213_v42 = vmul.f32 1.442695, %v210_v40 }
 0x217   :  { %357 = vpow2.f32 %v211_v41 }
 0x218   :  { %359 = vpow2.f32 %v213_v42 }
 0x224   :  { %v358_v43 = vpop.eup %357 }
 0x225   :  { %v360_v44 = vpop.eup %359  ;;  %218 = vperm.xlu0 %356, %v358_v43  }
 0x226   :  { %221 = vperm.xlu1 %355, %v360_v44  }
 0x2a0   :  { %v219_v45 = vpop.permute.xlu0 %218 }
 0x2a1   :  { %v222_v46 = vpop.permute.xlu1 %221  ;;  %v226_v47 = vrot.slane %v219_v45, %v185_v26 }
 0x2a2   :  { %v230_v48 = vrot.slane %v222_v46, %v185_v26 }
 0x2a4   :  { %v231_v49 = vsel %vm191_vm2, %v230_v48, %v226_v47 }
 0x2a5   :  { %v233_v50 = vsel %vm194_vm3, %v231_v49, 0.0 }
 0x2a6   :  { %234 = vadd.xlane.f32.xlu0 %v233_v50 }
 0x32f   :  { %v235_v51 = vpop.xlane.xlu0 %234 }
 0x330   :  { %361 = vrcp.f32 %v235_v51 }
 0x33d   :  { %v362_v52 = vpop.eup %361 }
 0x33e   :  { %v237_v53 = vmul.f32 %v362_v52, %v235_v51 }
 0x340   :  { %v238_v54 = vsub.f32 2.0, %v237_v53 }
 0x342   :  { %v239_v55 = vmul.f32 %v362_v52, %v238_v54 }
 0x344   :  { %v244_v56 = vrot.slane %v239_v55, %v201_v34  ;;  %v248_v57 = vrot.slane %v239_v55, %v205_v35 }
 0x346   :  { %v251_v58 = vmul.f32 %v358_v43, %v244_v56  ;;  %v252_v59 = vmul.f32 %v360_v44, %v248_v57 }
 0x348   :  { %255 = vperm.xlu1 %355, %v251_v58  }
 0x34c   :  { %260 = vperm.xlu1 %355, %v252_v59  }
 0x3c3   :  { %v256_v60 = vpop.permute.xlu1 %255 }
 0x3c4   :  { %v263_v61 = vmul.f32 %v256_v60, %v502_v3  ;;  %v288_v1 = vrot.slane %v256_v60, %v185_v26 }
 0x3c6   :  { %v265_v62 = vsel %vm67_vm0, %v263_v61, 0.0 }
 0x3c7   :  { %v266_v63 = vrot.slane %v265_v62, 4  ;;  %v261_v0 = vpop.permute.xlu1 %260 }
 0x3c8   :  { %v264_v2 = vmul.f32 %v261_v0, %v506_v6  ;;  %v292_v4 = vrot.slane %v261_v0, %v185_v26 }
 0x3c9   :  { %v267_v5 = vadd.f32 %v266_v63, %v265_v62 }
 0x3ca   :  { %v272_v7 = vsel %vm67_vm0, %v264_v2, 0.0  ;;  %v293_v8 = vsel %vm191_vm2, %v292_v4, %v288_v1 }
 0x3cb   :  { %v268_v9 = vrot.slane %v267_v5, 2  ;;  %v273_v10 = vrot.slane %v272_v7, 4  ;;  %295 = vst.msk [vmem:[#allocation9] sm:$0x3] %vm194_vm3, %v293_v8 }
 0x3cc   :  { %414 = shalt.err (!%p411_p0)
}
 0x3cd   :  { %315 = dma.vmem_to_hbm [thread:$0]  %s313_s3, 32, %s539_s6, [#allocation10]   ;;  %v269_v3 = vadd.f32 %v268_v9, %v267_v5  ;;  %v274_v6 = vadd.f32 %v273_v10, %v272_v7  ;;  %vm283_vm4 = vcmask 254976  }
 0x3ce   :  { %s457_s15 = smov [#allocation8]  }
 0x3cf   :  { %v275_v11 = vrot.slane %v274_v6, 2  ;;  %v270_v12 = vrot.slane %v269_v3, 1  ;;  %s302_s16 = sshll.u32 %s457_s15, 4  ;;  %s303_s16 = int_to_ptr.vmem [resolvable:$true] %s302_s16 }
 0x3d0   :  { %s423_s17 = scalar_lea.vmem %s303_s16, 32  ;;  %p428_p2 = scmp.lt.s32.totalorder %s303_s16, %s303_s16 }
 0x3d1   :  { %v276_v13 = vadd.f32 %v275_v11, %v274_v6  ;;  %v271_v16 = vadd.f32 %v270_v12, %v269_v3  ;;  %p424_p1 = scmp.ne.s32.totalorder %s303_s16, %s423_s17  ;;  %p429_p3 = scmp.lt.s32.totalorder %s423_s17, %s423_s17 }
 0x3d3   :  { %v277_v14 = vrot.slane %v276_v13, 1  ;;  %p430_p4 = por %p429_p3, %p428_p2 }
 0x3d5   :  { %v278_v15 = vadd.f32 %v277_v14, %v276_v13  ;;  %p431_p5 = pnand %p430_p4, %p424_p1 }
 0x3d7   :  { %v281_v17 = vsel %vm191_vm2, %v278_v15, %v271_v16 }
 0x3d8   :  { %284 = vst.msk [vmem:[#allocation8] sm:$0x3] %vm283_vm4, %v281_v17 }
 0x3d9   :  { %434 = shalt.err (!%p431_p5)
}
 0x3da   :  { %305 = dma.vmem_to_hbm [thread:$0]  %s303_s16, 32, %s538_s5, [#allocation5]  }
 0x3db   :  { %447 = dma.done.wait [#allocation5], 32  }
 0x3dc   :  { %448 = vsyncadd [#allocation5], 4294967264 }
 0x3dd   :  { %449 = dma.done.wait [#allocation10], 32  }
 0x3de   :  { %450 = vsyncadd [#allocation10], 4294967264 }
 0x3df   :  { %322 = vsyncpa [#allocation4], 1 }
 0x3e0   :  { %323 = vsyncpa [#allocation7], 1 }
 0x3e1   :  { %324 = vsyncpa [#allocation5], 1 }
 0x3e2   :  { %325 = vsyncpa [#allocation10], 1 }

</bundles_post_ra>
